<compile_context>
chip_gen: v7x
topology: tpu7x:2x2x1
jax: 0.10.0
libtpu: 0.0.40
codegen_flags: <defaults>
</compile_context>

<pallas_src>
import functools

import jax
import jax.numpy as jnp
from jax.experimental import pallas as pl
from jax.experimental.pallas import tpu as pltpu

_LANES = 128      # vreg lane width
_SUBLANES = 8     # vreg sublane width
_MAX_TB = 256     # batch-tile cap (multiple of 8)
_MAX_TS = 512     # seq-tile cap   (multiple of 128)


def _round_up(x, m):
    return ((x + m - 1) // m) * m


def _clipped_neg_surrogate(logp, old, adv, clip_eps):
    ratio = jnp.exp(logp - old)
    surr1 = ratio * adv
    surr2 = jnp.clip(ratio, 1.0 - clip_eps, 1.0 + clip_eps) * adv
    return -jnp.minimum(surr1, surr2)


def _lane_fold(acc, tile):
    """Accumulate a (TB, TS) tile into a (TB, 128) lane-wise accumulator."""
    ts = tile.shape[1]
    for k in range(ts // _LANES):          # static, lane-aligned slices (VPU only)
        acc = acc + tile[:, k * _LANES:(k + 1) * _LANES]
    return acc


def _masked_kernel(logp_ref, old_ref, adv_ref, mask_ref, num_ref, den_ref, *,
                   clip_eps):
    @pl.when(pl.program_id(1) == 0)
    def _init():
        num_ref[...] = jnp.zeros_like(num_ref)
        den_ref[...] = jnp.zeros_like(den_ref)

    logp = logp_ref[...].astype(jnp.float32)
    old = old_ref[...].astype(jnp.float32)
    adv = adv_ref[...].astype(jnp.float32)
    mask = mask_ref[...].astype(jnp.float32)

    loss = _clipped_neg_surrogate(logp, old, adv, clip_eps)

    num_ref[...] = _lane_fold(num_ref[...], loss * mask)
    den_ref[...] = _lane_fold(den_ref[...], mask)


def _unmasked_kernel(logp_ref, old_ref, adv_ref, num_ref, *, clip_eps):
    @pl.when(pl.program_id(1) == 0)
    def _init():
        num_ref[...] = jnp.zeros_like(num_ref)

    logp = logp_ref[...].astype(jnp.float32)
    old = old_ref[...].astype(jnp.float32)
    adv = adv_ref[...].astype(jnp.float32)

    loss = _clipped_neg_surrogate(logp, old, adv, clip_eps)
    num_ref[...] = _lane_fold(num_ref[...], loss)


def policy_loss(log_probs, old_log_probs, advantages, action_mask=None,
                clip_eps=0.2):
    """Scalar PPO clipped policy loss (float32), matching coati's PolicyLoss."""
    B, S = log_probs.shape

    # ---- pick lane-dense tiles and pad to tile multiples --------------------
    b_pad = _round_up(B, _SUBLANES)
    s_pad = _round_up(S, _LANES)
    tb = min(_MAX_TB, b_pad)
    ts = min(_MAX_TS, s_pad)
    b_pad = _round_up(b_pad, tb)
    s_pad = _round_up(s_pad, ts)

    def pad(x):
        if x.shape == (b_pad, s_pad):
            return x
        return jnp.pad(x, ((0, b_pad - B), (0, s_pad - S)))

    # Keep incoming dtype (bf16 halves HBM traffic); upcast to f32 in-kernel.
    logp = pad(log_probs)
    old = pad(old_log_probs)
    adv = pad(advantages)

    grid = (b_pad // tb, s_pad // ts)
    in_spec = pl.BlockSpec((tb, ts), lambda i, j: (i, j))
    # Per-row lane-wise accumulators, resident across the S ("arbitrary") axis.
    acc_spec = pl.BlockSpec((tb, _LANES), lambda i, j: (i, 0))
    acc_shape = jax.ShapeDtypeStruct((b_pad, _LANES), jnp.float32)
    cparams = pltpu.CompilerParams(
        dimension_semantics=("parallel", "arbitrary"))

    if action_mask is not None:
        mask = pad(action_mask.astype(log_probs.dtype))
        num, den = pl.pallas_call(
            functools.partial(_masked_kernel, clip_eps=clip_eps),
            grid=grid,
            in_specs=[in_spec, in_spec, in_spec, in_spec],
            out_specs=(acc_spec, acc_spec),
            out_shape=(acc_shape, acc_shape),
            compiler_params=cparams,
        )(logp, old, adv, mask)
        row_num = jnp.sum(num[:B], axis=1)            # (B,)
        row_den = jnp.sum(den[:B], axis=1)            # (B,)
        per_row = row_num / (row_den + 1e-8)          # masked_mean(dim=1), exact divide
        return jnp.mean(per_row)
    else:
        num = pl.pallas_call(
            functools.partial(_unmasked_kernel, clip_eps=clip_eps),
            grid=grid,
            in_specs=[in_spec, in_spec, in_spec],
            out_specs=acc_spec,
            out_shape=acc_shape,
            compiler_params=cparams,
        )(logp, old, adv)
        # Padded elements contribute exactly 0 (advantages padded with 0), so
        # the unmasked mean is total_sum / (B * S).
        return jnp.sum(num[:B]) / (B * S)


def _reference(log_probs, old_log_probs, advantages, action_mask=None,
               clip_eps=0.2):
    ratio = jnp.exp(log_probs - old_log_probs)
    surr1 = ratio * advantages
    surr2 = jnp.clip(ratio, 1.0 - clip_eps, 1.0 + clip_eps) * advantages
    loss = -jnp.minimum(surr1, surr2)
    if action_mask is not None:
        loss = (loss * action_mask).sum(axis=1) / (action_mask.sum(axis=1) + 1e-8)
    return loss.mean()


if __name__ == "__main__":
    key = jax.random.PRNGKey(0)

    # --- small shapes consistent with the module (batch=2, action len=8) ----
    B, S = 2, 8
    k1, k2, k3, k4 = jax.random.split(key, 4)
    log_probs = jax.random.normal(k1, (B, S), dtype=jnp.float32) * 0.1 - 1.0
    old_log_probs = jax.random.normal(k2, (B, S), dtype=jnp.float32) * 0.1 - 1.0
    advantages = jax.random.normal(k3, (B, S), dtype=jnp.float32)
    action_mask = (jax.random.uniform(k4, (B, S)) > 0.3).astype(jnp.float32)

    loss_masked = policy_loss(log_probs, old_log_probs, advantages, action_mask)
    loss_unmasked = policy_loss(log_probs, old_log_probs, advantages, None)
    jax.block_until_ready((loss_masked, loss_unmasked))

    ref_masked = _reference(log_probs, old_log_probs, advantages, action_mask)
    ref_unmasked = _reference(log_probs, old_log_probs, advantages, None)
    assert jnp.allclose(loss_masked, ref_masked, atol=1e-5, rtol=1e-4), (
        loss_masked, ref_masked)
    assert jnp.allclose(loss_unmasked, ref_unmasked, atol=1e-5, rtol=1e-4), (
        loss_unmasked, ref_unmasked)

    # --- a second, larger case that exercises the multi-step S grid + padding
    B2, S2 = 16, 640
    k5, k6, k7, k8 = jax.random.split(jax.random.PRNGKey(1), 4)
    lp2 = jax.random.normal(k5, (B2, S2), dtype=jnp.float32) * 0.1 - 1.0
    olp2 = jax.random.normal(k6, (B2, S2), dtype=jnp.float32) * 0.1 - 1.0
    adv2 = jax.random.normal(k7, (B2, S2), dtype=jnp.float32)
    msk2 = (jax.random.uniform(k8, (B2, S2)) > 0.3).astype(jnp.float32)

    lm2 = policy_loss(lp2, olp2, adv2, msk2)
    lu2 = policy_loss(lp2, olp2, adv2, None)
    jax.block_until_ready((lm2, lu2))
    assert jnp.allclose(lm2, _reference(lp2, olp2, adv2, msk2),
                        atol=1e-5, rtol=1e-4), (lm2,)
    assert jnp.allclose(lu2, _reference(lp2, olp2, adv2, None),
                        atol=1e-5, rtol=1e-4), (lu2,)

    print("KERNEL_OK")
</pallas_src>

<mosaic_0001>
module attributes {stable_mosaic.version = 11 : i64} {
  func.func @_masked_kernel(%arg0: i32, %arg1: i32, %arg2: memref<8x128xf32, #tpu.memory_space<vmem>>, %arg3: memref<8x128xf32, #tpu.memory_space<vmem>>, %arg4: memref<8x128xf32, #tpu.memory_space<vmem>>, %arg5: memref<8x128xf32, #tpu.memory_space<vmem>>, %arg6: memref<8x128xf32, #tpu.memory_space<vmem>>, %arg7: memref<8x128xf32, #tpu.memory_space<vmem>>) attributes {dimension_semantics = [#tpu.dimension_semantics<parallel>, #tpu.dimension_semantics<arbitrary>], iteration_bounds = array<i64: 1, 1>, scalar_prefetch = 0 : i64, scratch_operands = 0 : i64, tpu.core_type = #tpu.core_type<tc>, window_params = [{transform_indices = @transform_0, window_bounds = array<i64: 8, 128>}, {transform_indices = @transform_1, window_bounds = array<i64: 8, 128>}, {transform_indices = @transform_2, window_bounds = array<i64: 8, 128>}, {transform_indices = @transform_3, window_bounds = array<i64: 8, 128>}, {transform_indices = @transform_4, window_bounds = array<i64: 8, 128>}, {transform_indices = @transform_5, window_bounds = array<i64: 8, 128>}]} {
    %c0_i32 = arith.constant 0 : i32
    %0 = arith.cmpi eq, %arg1, %c0_i32 : i32
    %1 = arith.extui %0 : i1 to i32
    %c0_i32_0 = arith.constant 0 : i32
    %2 = arith.cmpi ne, %1, %c0_i32_0 : i32
    scf.if %2 {
      %cst_18 = arith.constant 0.000000e+00 : f32
      %25 = vector.broadcast %cst_18 : f32 to vector<8x128xf32>
      %c0_19 = arith.constant 0 : index
      %c0_20 = arith.constant 0 : index
      %26 = vector.load %arg6[%c0_19, %c0_20] : memref<8x128xf32, #tpu.memory_space<vmem>>, vector<8x128xf32>
      tpu.vector_store %arg6[%c0_19, %c0_20], %25 {strides = array<i32>} : memref<8x128xf32, #tpu.memory_space<vmem>>, vector<8x128xf32>,
      %cst_21 = arith.constant 0.000000e+00 : f32
      %27 = vector.broadcast %cst_21 : f32 to vector<8x128xf32>
      %c0_22 = arith.constant 0 : index
      %c0_23 = arith.constant 0 : index
      %28 = vector.load %arg7[%c0_22, %c0_23] : memref<8x128xf32, #tpu.memory_space<vmem>>, vector<8x128xf32>
      tpu.vector_store %arg7[%c0_22, %c0_23], %27 {strides = array<i32>} : memref<8x128xf32, #tpu.memory_space<vmem>>, vector<8x128xf32>,
    } else {
    }
    %c0 = arith.constant 0 : index
    %c0_1 = arith.constant 0 : index
    %3 = vector.load %arg2[%c0, %c0_1] : memref<8x128xf32, #tpu.memory_space<vmem>>, vector<8x128xf32>
    %c0_2 = arith.constant 0 : index
    %c0_3 = arith.constant 0 : index
    %4 = vector.load %arg3[%c0_2, %c0_3] : memref<8x128xf32, #tpu.memory_space<vmem>>, vector<8x128xf32>
    %c0_4 = arith.constant 0 : index
    %c0_5 = arith.constant 0 : index
    %5 = vector.load %arg4[%c0_4, %c0_5] : memref<8x128xf32, #tpu.memory_space<vmem>>, vector<8x128xf32>
    %c0_6 = arith.constant 0 : index
    %c0_7 = arith.constant 0 : index
    %6 = vector.load %arg5[%c0_6, %c0_7] : memref<8x128xf32, #tpu.memory_space<vmem>>, vector<8x128xf32>
    %7 = arith.subf %3, %4 : vector<8x128xf32>
    %8 = math.exp %7 : vector<8x128xf32>
    %9 = arith.mulf %8, %5 : vector<8x128xf32>
    %cst = arith.constant 8.000000e-01 : f32
    %cst_8 = arith.constant 1.200000e+00 : f32
    %10 = vector.broadcast %cst : f32 to vector<8x128xf32>
    %11 = arith.maximumf %10, %8 : vector<8x128xf32>
    %12 = vector.broadcast %cst_8 : f32 to vector<8x128xf32>
    %13 = arith.minimumf %12, %11 : vector<8x128xf32>
    %14 = arith.mulf %13, %5 : vector<8x128xf32>
    %15 = arith.minimumf %9, %14 : vector<8x128xf32>
    %cst_9 = arith.constant 0.000000e+00 : f32
    %16 = vector.broadcast %cst_9 : f32 to vector<8x128xf32>
    %17 = arith.subf %16, %15 : vector<8x128xf32>
    %c0_10 = arith.constant 0 : index
    %c0_11 = arith.constant 0 : index
    %18 = vector.load %arg6[%c0_10, %c0_11] : memref<8x128xf32, #tpu.memory_space<vmem>>, vector<8x128xf32>
    %19 = arith.mulf %17, %6 : vector<8x128xf32>
    %20 = arith.addf %18, %19 : vector<8x128xf32>
    %c0_12 = arith.constant 0 : index
    %c0_13 = arith.constant 0 : index
    %21 = vector.load %arg6[%c0_12, %c0_13] : memref<8x128xf32, #tpu.memory_space<vmem>>, vector<8x128xf32>
    tpu.vector_store %arg6[%c0_12, %c0_13], %20 {strides = array<i32>} : memref<8x128xf32, #tpu.memory_space<vmem>>, vector<8x128xf32>,
    %c0_14 = arith.constant 0 : index
    %c0_15 = arith.constant 0 : index
    %22 = vector.load %arg7[%c0_14, %c0_15] : memref<8x128xf32, #tpu.memory_space<vmem>>, vector<8x128xf32>
    %23 = arith.addf %22, %6 : vector<8x128xf32>
    %c0_16 = arith.constant 0 : index
    %c0_17 = arith.constant 0 : index
    %24 = vector.load %arg7[%c0_16, %c0_17] : memref<8x128xf32, #tpu.memory_space<vmem>>, vector<8x128xf32>
    tpu.vector_store %arg7[%c0_16, %c0_17], %23 {strides = array<i32>} : memref<8x128xf32, #tpu.memory_space<vmem>>, vector<8x128xf32>,
    return
  }
  func.func @transform_0(%arg0: i32, %arg1: i32) -> (i32, i32) {
    %c0_i32 = arith.constant 0 : i32
    return %arg0, %arg1 : i32, i32
  }
  func.func @transform_1(%arg0: i32, %arg1: i32) -> (i32, i32) {
    %c0_i32 = arith.constant 0 : i32
    return %arg0, %arg1 : i32, i32
  }
  func.func @transform_2(%arg0: i32, %arg1: i32) -> (i32, i32) {
    %c0_i32 = arith.constant 0 : i32
    return %arg0, %arg1 : i32, i32
  }
  func.func @transform_3(%arg0: i32, %arg1: i32) -> (i32, i32) {
    %c0_i32 = arith.constant 0 : i32
    return %arg0, %arg1 : i32, i32
  }
  func.func @transform_4(%arg0: i32, %arg1: i32) -> (i32, i32) {
    %c0_i32 = arith.constant 0 : i32
    %c0_i32_0 = arith.constant 0 : i32
    return %arg0, %c0_i32 : i32, i32
  }
  func.func @transform_5(%arg0: i32, %arg1: i32) -> (i32, i32) {
    %c0_i32 = arith.constant 0 : i32
    %c0_i32_0 = arith.constant 0 : i32
    return %arg0, %c0_i32 : i32, i32
  }
}

</mosaic_0001>

<bundles_post_ra>
// kernel: tpu_custom_call.1
= control target key start
LH: loop header
LB: loop body
LE: loop exit
PB: predicated region body
PF: predicated region fallthrough
CT: control target
= control target key end

     0   :  { %11 = vsyncpa [#allocation3], 0  ;;  %s336_s0 = inlined_call_operand.hbm [shape: f32[8,128], index: 0, kind: input, shape index: {}]   ;;  %s337_s1 = inlined_call_operand.hbm [shape: f32[8,128], index: 1, kind: input, shape index: {}]   ;;  %s338_s2 = inlined_call_operand.hbm [shape: f32[8,128], index: 2, kind: input, shape index: {}]   ;;  %s339_s3 = inlined_call_operand.vmem [shape: f32[8,128], index: 3, kind: input, shape index: {}]   ;;  %s340_s4 = inlined_call_operand.hbm [shape: f32[8,128], index: 4, kind: output, shape index: {0}]   ;;  %s341_s5 = inlined_call_operand.hbm [shape: f32[8,128], index: 5, kind: output, shape index: {1}]  }
   0x1   :  { %12 = vsyncpa [#allocation6], 0 }
   0x2   :  { %13 = vsyncpa [#allocation4], 0 }
   0x3   :  { %14 = vsyncpa [#allocation10], 0  ;;  %s238_s18 = smov [#allocation5]   ;;  %s239_s20 = smov [#allocation2]  }
   0x4   :  { %s31_s19 = sshll.u32 %s238_s18, 4  ;;  %s21_s21 = sshll.u32 %s239_s20, 4  ;;  %s32_s19 = int_to_ptr.vmem [resolvable:$true] %s31_s19  ;;  %s22_s21 = int_to_ptr.vmem [resolvable:$true] %s21_s21 }
   0x5   :  { %s120_s24 = scalar_lea.hbm %s337_s1, 128 }
   0x6   :  { %p121_p0 = scmp.ne.s32.totalorder %s337_s1, %s120_s24  ;;  %p124_p1 = scmp.lt.u32.totalorder %s120_s24, %s337_s1 }
   0x8   :  { %p126_p2 = pnand %p124_p1, %p121_p0 }
   0xa   :  { %129 = shalt.err (!%p126_p2)
}
   0xb   :  { %s130_s29 = scalar_lea.vmem %s32_s19, 128  ;;  %p135_p4 = scmp.lt.s32.totalorder %s32_s19, %s32_s19 }
   0xc   :  { %p131_p3 = scmp.ne.s32.totalorder %s32_s19, %s130_s29  ;;  %p136_p5 = scmp.lt.s32.totalorder %s130_s29, %s130_s29 }
   0xe   :  { %p137_p6 = por %p136_p5, %p135_p4 }
  0x10   :  { %p138_p7 = pnand %p137_p6, %p131_p3 }
  0x12   :  { %141 = shalt.err (!%p138_p7)
}
  0x13   :  { %34 = dma.hbm_to_vmem [thread:$0]  %s337_s1, 128, %s32_s19, [#allocation6]  }
  0x14   :  { %s142_s9 = scalar_lea.hbm %s336_s0, 128 }
  0x15   :  { %p143_p8 = scmp.ne.s32.totalorder %s336_s0, %s142_s9  ;;  %p146_p9 = scmp.lt.u32.totalorder %s142_s9, %s336_s0 }
  0x17   :  { %p148_p10 = pnand %p146_p9, %p143_p8 }
  0x19   :  { %151 = shalt.err (!%p148_p10)
}
  0x1a   :  { %s152_s14 = scalar_lea.vmem %s22_s21, 128  ;;  %p157_p12 = scmp.lt.s32.totalorder %s22_s21, %s22_s21 }
  0x1b   :  { %p153_p11 = scmp.ne.s32.totalorder %s22_s21, %s152_s14  ;;  %p158_p13 = scmp.lt.s32.totalorder %s152_s14, %s152_s14 }
  0x1d   :  { %p159_p0 = por %p158_p13, %p157_p12 }
  0x1f   :  { %p160_p1 = pnand %p159_p0, %p153_p11 }
  0x21   :  { %163 = shalt.err (!%p160_p1)
}
  0x22   :  { %24 = dma.hbm_to_vmem [thread:$0]  %s336_s0, 128, %s22_s21, [#allocation3]  }
  0x23   :  { %s240_s16 = smov [#allocation7]   ;;  %s164_s20 = scalar_lea.hbm %s338_s2, 128 }
  0x24   :  { %s41_s17 = sshll.u32 %s240_s16, 4  ;;  %p165_p2 = scmp.ne.s32.totalorder %s338_s2, %s164_s20  ;;  %s42_s17 = int_to_ptr.vmem [resolvable:$true] %s41_s17 }
  0x25   :  { %p168_p3 = scmp.lt.u32.totalorder %s164_s20, %s338_s2 }
  0x27   :  { %p170_p4 = pnand %p168_p3, %p165_p2 }
  0x29   :  { %173 = shalt.err (!%p170_p4)
}
  0x2a   :  { %s174_s26 = scalar_lea.vmem %s42_s17, 128  ;;  %p179_p6 = scmp.lt.s32.totalorder %s42_s17, %s42_s17 }
  0x2b   :  { %p175_p5 = scmp.ne.s32.totalorder %s42_s17, %s174_s26  ;;  %p180_p7 = scmp.lt.s32.totalorder %s174_s26, %s174_s26 }
  0x2d   :  { %p181_p8 = por %p180_p7, %p179_p6 }
  0x2f   :  { %p182_p9 = pnand %p181_p8, %p175_p5 }
  0x31   :  { %185 = shalt.err (!%p182_p9)
}
  0x32   :  { %44 = dma.hbm_to_vmem [thread:$0]  %s338_s2, 128, %s42_s17, [#allocation6]  }
  0x33   :  { %230 = dma.done.wait [#allocation3], 128  }
  0x34   :  { %231 = vsyncadd [#allocation3], 4294967168 }
  0x35   :  { %232 = dma.done.wait [#allocation6], 256  }
  0x36   :  { %233 = vsyncadd [#allocation6], 4294967040  ;;  %s241_s27 = smov [#allocation9]   ;;  %v62_v0 = vld [vmem:[#allocation2] sm:$0xff]  ;;  %v63_v1 = vld [vmem:[#allocation5] sm:$0xff] }
  0x37   :  { %s98_s28 = sshll.u32 %s241_s27, 4  ;;  %v65_v2 = vld [vmem:[%s339_s3] sm:$0xff]  ;;  %v66_v3 = vsub.f32 %v62_v0, %v63_v1  ;;  %s99_s28 = int_to_ptr.vmem [resolvable:$true] %s98_s28 }
  0x38   :  { %81 = vst [vmem:[#allocation9] sm:$0xff] %v65_v2  ;;  %s186_s6 = scalar_lea.vmem %s99_s28, 128  ;;  %p191_p11 = scmp.lt.s32.totalorder %s99_s28, %s99_s28 }
  0x39   :  { %v67_v4 = vmul.f32 1.442695, %v66_v3  ;;  %p187_p10 = scmp.ne.s32.totalorder %s99_s28, %s186_s6  ;;  %p192_p12 = scmp.lt.s32.totalorder %s186_s6, %s186_s6 }
  0x3b   :  { %118 = vpow2.f32 %v67_v4  ;;  %p193_p13 = por %p192_p12, %p191_p11 }
  0x3d   :  { %p194_p0 = pnand %p193_p13, %p187_p10 }
  0x3f   :  { %197 = shalt.err (!%p194_p0)
}
  0x40   :  { %s198_s8 = scalar_lea.hbm %s341_s5, 128 }
  0x41   :  { %p199_p1 = scmp.ne.s32.totalorder %s341_s5, %s198_s8  ;;  %p202_p2 = scmp.lt.u32.totalorder %s198_s8, %s341_s5 }
  0x43   :  { %p204_p3 = pnand %p202_p2, %p199_p1 }
  0x45   :  { %207 = shalt.err (!%p204_p3)
}
  0x46   :  { %101 = dma.vmem_to_hbm [thread:$0]  %s99_s28, 128, %s341_s5, [#allocation10]   ;;  %v119_v5 = vpop.eup %118  ;;  %v64_v6 = vld [vmem:[#allocation7] sm:$0xff] }
  0x47   :  { %v70_v7 = vmax.f32 %v119_v5, 0.8  ;;  %v69_v8 = vmul.f32 %v119_v5, %v64_v6  ;;  %s242_s14 = smov [#allocation8]  }
  0x48   :  { %s88_s1 = sshll.u32 %s242_s14, 4  ;;  %s89_s1 = int_to_ptr.vmem [resolvable:$true] %s88_s1 }
  0x49   :  { %v71_v9 = vmin.f32 %v70_v7, 1.2  ;;  %s208_s15 = scalar_lea.vmem %s89_s1, 128  ;;  %p213_p5 = scmp.lt.s32.totalorder %s89_s1, %s89_s1 }
  0x4a   :  { %p209_p4 = scmp.ne.s32.totalorder %s89_s1, %s208_s15  ;;  %p214_p6 = scmp.lt.s32.totalorder %s208_s15, %s208_s15 }
  0x4b   :  { %v72_v10 = vmul.f32 %v71_v9, %v64_v6 }
  0x4c   :  { %p215_p7 = por %p214_p6, %p213_p5 }
  0x4d   :  { %v73_v11 = vmin.f32 %v69_v8, %v72_v10 }
  0x4e   :  { %p216_p8 = pnand %p215_p7, %p209_p4 }
  0x4f   :  { %v74_v12 = vsub.f32 0.0, %v73_v11 }
  0x51   :  { %v76_v13 = vmul.f32 %v74_v12, %v65_v2 }
  0x53   :  { %78 = vst [vmem:[#allocation8] sm:$0xff] %v76_v13 }
  0x54   :  { %219 = shalt.err (!%p216_p8)
}
  0x55   :  { %s220_s17 = scalar_lea.hbm %s340_s4, 128 }
  0x56   :  { %p221_p9 = scmp.ne.s32.totalorder %s340_s4, %s220_s17  ;;  %p224_p10 = scmp.lt.u32.totalorder %s220_s17, %s340_s4 }
  0x58   :  { %p226_p11 = pnand %p224_p10, %p221_p9 }
  0x5a   :  { %229 = shalt.err (!%p226_p11)
}
  0x5b   :  { %91 = dma.vmem_to_hbm [thread:$0]  %s89_s1, 128, %s340_s4, [#allocation4]  }
  0x5c   :  { %234 = dma.done.wait [#allocation4], 128  }
  0x5d   :  { %235 = vsyncadd [#allocation4], 4294967168 }
  0x5e   :  { %236 = dma.done.wait [#allocation10], 128  }
  0x5f   :  { %237 = vsyncadd [#allocation10], 4294967168 }
  0x60   :  { %108 = vsyncpa [#allocation3], 1 }
  0x61   :  { %109 = vsyncpa [#allocation6], 1 }
  0x62   :  { %110 = vsyncpa [#allocation4], 1 }
  0x63   :  { %111 = vsyncpa [#allocation10], 1 }

</bundles_post_ra>
